<compile_context>
chip_gen: v6e
topology: v6e:2x2x1
jax: 0.10.0
libtpu: 0.0.40
codegen_flags: <defaults>
</compile_context>

<pallas_src>
import functools

import jax
import jax.numpy as jnp
from jax.experimental import pallas as pl
from jax.experimental.pallas import tpu as pltpu


def _round_up(x, m):
    return ((x + m - 1) // m) * m


def _actor_kernel(x_ref, w1_ref, b1_ref, w2_ref, b2_ref, o_ref, *, action_bound):
    # fc1: (TB, S) @ (S, H) on the MXU (bf16 in, f32 accumulate).
    h = jnp.dot(x_ref[...], w1_ref[...], preferred_element_type=jnp.float32)
    h = jnp.maximum(h + b1_ref[...], 0.0)                       # bias + ReLU in f32 (VPU)
    # fc2: (TB, H) @ (H, A), bf16 MXU path with f32 accumulate.
    a = jnp.dot(h.astype(jnp.bfloat16), w2_ref[...],
                preferred_element_type=jnp.float32)
    a = a + b2_ref[...]
    # tanh on the EUP, scale on the VPU; lane-dense f32 store (A padded to 128).
    o_ref[...] = jnp.tanh(a) * action_bound


@functools.partial(jax.jit, static_argnums=(5,), static_argnames=("tile_b",))
def actor_forward(x, w1, b1, w2, b2, action_bound, *, tile_b=256):
    """DDPG Actor forward: tanh(relu(x @ w1 + b1) @ w2 + b2) * action_bound.

    x: (B, S) f32; w1: (S, H); b1: (H,)|(1, H); w2: (H, A); b2: (A,)|(1, A).
    Weights are stored transposed relative to PyTorch's (out, in) layout.
    `action_bound` is a static compile-time constant (matches the module attr).
    """
    x = jnp.asarray(x, jnp.float32)
    w1 = jnp.asarray(w1, jnp.float32)
    w2 = jnp.asarray(w2, jnp.float32)
    b1 = jnp.asarray(b1, jnp.float32).reshape(1, -1)
    b2 = jnp.asarray(b2, jnp.float32).reshape(1, -1)

    B, S = x.shape
    H = w1.shape[1]
    A = w2.shape[1]

    # MXU/lane-friendly padding: feature dims to multiples of 128.
    S_p = _round_up(S, 128)
    H_p = _round_up(H, 128)
    A_p = _round_up(A, 128)

    # Batch tiling: bounds VMEM regardless of B, keeps (8,128) tiling legal.
    TB = min(_round_up(B, 8), tile_b)
    B_p = _round_up(B, TB)

    # Zero padding preserves semantics: padded x columns hit zero weight rows,
    # padded hidden units are ReLU(0)=0 and multiply zero w2 rows, and padded
    # action columns are sliced off below.
    x_p = jnp.zeros((B_p, S_p), jnp.bfloat16).at[:B, :S].set(x.astype(jnp.bfloat16))
    w1_p = jnp.zeros((S_p, H_p), jnp.bfloat16).at[:S, :H].set(w1.astype(jnp.bfloat16))
    w2_p = jnp.zeros((H_p, A_p), jnp.bfloat16).at[:H, :A].set(w2.astype(jnp.bfloat16))
    b1_p = jnp.zeros((1, H_p), jnp.float32).at[:, :H].set(b1)
    b2_p = jnp.zeros((1, A_p), jnp.float32).at[:, :A].set(b2)

    grid = (B_p // TB,)

    # VMEM budget: double-buffered streamed blocks + resident weights/biases
    # + headroom for the f32 hidden activation and compiler scratch.
    stream_bytes = TB * S_p * 2 + TB * A_p * 4          # x tile (bf16) + out tile (f32)
    resident_bytes = (S_p * H_p * 2 + H_p * A_p * 2     # weights (bf16)
                      + H_p * 4 + A_p * 4)              # biases (f32)
    vmem_limit = int(min(2 * stream_bytes + resident_bytes
                         + TB * H_p * 4 + (8 << 20), 64 << 20))

    cost = pl.CostEstimate(
        flops=2 * B_p * S_p * H_p + 2 * B_p * H_p * A_p,
        transcendentals=B_p * A_p,
        bytes_accessed=(x_p.size * 2 + w1_p.size * 2 + w2_p.size * 2
                        + b1_p.size * 4 + b2_p.size * 4 + B_p * A_p * 4),
    )

    kernel = functools.partial(_actor_kernel, action_bound=float(action_bound))

    out_p = pl.pallas_call(
        kernel,
        out_shape=jax.ShapeDtypeStruct((B_p, A_p), jnp.float32),
        grid=grid,
        in_specs=[
            pl.BlockSpec((TB, S_p), lambda i: (i, 0)),    # x: streamed per batch tile
            pl.BlockSpec((S_p, H_p), lambda i: (0, 0)),   # w1: VMEM-resident
            pl.BlockSpec((1, H_p), lambda i: (0, 0)),     # b1
            pl.BlockSpec((H_p, A_p), lambda i: (0, 0)),   # w2
            pl.BlockSpec((1, A_p), lambda i: (0, 0)),     # b2
        ],
        out_specs=pl.BlockSpec((TB, A_p), lambda i: (i, 0)),
        compiler_params=pltpu.CompilerParams(
            dimension_semantics=("parallel",),            # shard batch tiles across TCs (v7x)
            vmem_limit_bytes=vmem_limit,
        ),
        cost_estimate=cost,
    )(x_p, w1_p, b1_p, w2_p, b2_p)

    return out_p[:B, :A]


def reference_forward(x, w1, b1, w2, b2, action_bound):
    h = jnp.maximum(x @ w1 + b1, 0.0)
    return jnp.tanh(h @ w2 + b2) * action_bound


if __name__ == "__main__":
    # Small shapes consistent with the module's forward.
    batch, state_dim, hidden_dim, action_dim = 8, 16, 32, 8
    action_bound = 2.0

    key = jax.random.PRNGKey(0)
    kx, k1, k2, k3, k4 = jax.random.split(key, 5)

    x = jax.random.normal(kx, (batch, state_dim), dtype=jnp.float32)

    # Deterministic parameter init (PyTorch Linear-style uniform bounds).
    lim1 = 1.0 / (state_dim ** 0.5)
    w1 = jax.random.uniform(k1, (state_dim, hidden_dim), jnp.float32, -lim1, lim1)
    b1 = jax.random.uniform(k2, (1, hidden_dim), jnp.float32, -lim1, lim1)
    lim2 = 1.0 / (hidden_dim ** 0.5)
    w2 = jax.random.uniform(k3, (hidden_dim, action_dim), jnp.float32, -lim2, lim2)
    b2 = jax.random.uniform(k4, (1, action_dim), jnp.float32, -lim2, lim2)

    out = actor_forward(x, w1, b1, w2, b2, action_bound)
    out = jax.block_until_ready(out)

    ref = reference_forward(x, w1, b1, w2, b2, action_bound)
    assert out.shape == (batch, action_dim)
    max_err = float(jnp.max(jnp.abs(out - ref)))
    # bf16 matmul inputs with f32 accumulation -> small, bounded error vs f32 ref.
    assert jnp.allclose(out, ref, atol=3e-2, rtol=3e-2), (
        f"mismatch vs reference (max abs err {max_err})")

    print("KERNEL_OK")
</pallas_src>

<mosaic_0001>
module attributes {stable_mosaic.version = 11 : i64} {
  func.func @_actor_kernel(%arg0: i32, %arg1: memref<8x128xbf16, #tpu.memory_space<vmem>>, %arg2: memref<128x128xbf16, #tpu.memory_space<vmem>>, %arg3: memref<1x128xf32, #tpu.memory_space<vmem>>, %arg4: memref<128x128xbf16, #tpu.memory_space<vmem>>, %arg5: memref<1x128xf32, #tpu.memory_space<vmem>>, %arg6: memref<8x128xf32, #tpu.memory_space<vmem>>) attributes {dimension_semantics = [#tpu.dimension_semantics<parallel>], iteration_bounds = array<i64: 1>, scalar_prefetch = 0 : i64, scratch_operands = 0 : i64, tpu.core_type = #tpu.core_type<tc>, window_params = [{transform_indices = @transform_0, window_bounds = array<i64: 8, 128>}, {pipeline_mode = #tpu.pipeline_mode<synchronous>, transform_indices = @transform_1, window_bounds = array<i64: 128, 128>}, {pipeline_mode = #tpu.pipeline_mode<synchronous>, transform_indices = @transform_2, window_bounds = array<i64: 1, 128>}, {pipeline_mode = #tpu.pipeline_mode<synchronous>, transform_indices = @transform_3, window_bounds = array<i64: 128, 128>}, {pipeline_mode = #tpu.pipeline_mode<synchronous>, transform_indices = @transform_4, window_bounds = array<i64: 1, 128>}, {transform_indices = @transform_5, window_bounds = array<i64: 8, 128>}]} {
    %c0 = arith.constant 0 : index
    %c0_0 = arith.constant 0 : index
    %0 = vector.load %arg1[%c0, %c0_0] : memref<8x128xbf16, #tpu.memory_space<vmem>>, vector<8x128xbf16>
    %c0_1 = arith.constant 0 : index
    %c0_2 = arith.constant 0 : index
    %1 = vector.load %arg2[%c0_1, %c0_2] : memref<128x128xbf16, #tpu.memory_space<vmem>>, vector<128x128xbf16>
    %cst = arith.constant dense<0.000000e+00> : vector<8x128xf32>
    %2 = tpu.matmul %0, %1, %cst {dimension_numbers = #tpu.dot_dimension_numbers<[1], [0], [0], [1], [0, 0, 1, 1], [], []>} : vector<8x128xbf16>, vector<128x128xbf16>, vector<8x128xf32> -> vector<8x128xf32>
    %c0_3 = arith.constant 0 : index
    %c0_4 = arith.constant 0 : index
    %3 = vector.load %arg3[%c0_3, %c0_4] : memref<1x128xf32, #tpu.memory_space<vmem>>, vector<1x128xf32>
    %4 = vector.broadcast %3 : vector<1x128xf32> to vector<8x128xf32>
    %5 = arith.addf %2, %4 : vector<8x128xf32>
    %cst_5 = arith.constant 0.000000e+00 : f32
    %6 = vector.broadcast %cst_5 : f32 to vector<8x128xf32>
    %7 = arith.maximumf %5, %6 : vector<8x128xf32>
    %8 = arith.truncf %7 : vector<8x128xf32> to vector<8x128xbf16>
    %c0_6 = arith.constant 0 : index
    %c0_7 = arith.constant 0 : index
    %9 = vector.load %arg4[%c0_6, %c0_7] : memref<128x128xbf16, #tpu.memory_space<vmem>>, vector<128x128xbf16>
    %cst_8 = arith.constant dense<0.000000e+00> : vector<8x128xf32>
    %10 = tpu.matmul %8, %9, %cst_8 {dimension_numbers = #tpu.dot_dimension_numbers<[1], [0], [0], [1], [0, 0, 1, 1], [], []>} : vector<8x128xbf16>, vector<128x128xbf16>, vector<8x128xf32> -> vector<8x128xf32>
    %c0_9 = arith.constant 0 : index
    %c0_10 = arith.constant 0 : index
    %11 = vector.load %arg5[%c0_9, %c0_10] : memref<1x128xf32, #tpu.memory_space<vmem>>, vector<1x128xf32>
    %12 = vector.broadcast %11 : vector<1x128xf32> to vector<8x128xf32>
    %13 = arith.addf %10, %12 : vector<8x128xf32>
    %14 = math.tanh %13 : vector<8x128xf32>
    %cst_11 = arith.constant 2.000000e+00 : f32
    %15 = vector.broadcast %cst_11 : f32 to vector<8x128xf32>
    %16 = arith.mulf %14, %15 : vector<8x128xf32>
    %c0_12 = arith.constant 0 : index
    %c0_13 = arith.constant 0 : index
    %17 = vector.load %arg6[%c0_12, %c0_13] : memref<8x128xf32, #tpu.memory_space<vmem>>, vector<8x128xf32>
    tpu.vector_store %arg6[%c0_12, %c0_13], %16 {strides = array<i32>} : memref<8x128xf32, #tpu.memory_space<vmem>>, vector<8x128xf32>,
    return
  }
  func.func @transform_0(%arg0: i32) -> (i32, i32) {
    %c0_i32 = arith.constant 0 : i32
    %c0_i32_0 = arith.constant 0 : i32
    return %arg0, %c0_i32 : i32, i32
  }
  func.func @transform_1(%arg0: i32) -> (i32, i32) {
    %c0_i32 = arith.constant 0 : i32
    %c0_i32_0 = arith.constant 0 : i32
    %c0_i32_1 = arith.constant 0 : i32
    return %c0_i32, %c0_i32_0 : i32, i32
  }
  func.func @transform_2(%arg0: i32) -> (i32, i32) {
    %c0_i32 = arith.constant 0 : i32
    %c0_i32_0 = arith.constant 0 : i32
    %c0_i32_1 = arith.constant 0 : i32
    return %c0_i32, %c0_i32_0 : i32, i32
  }
  func.func @transform_3(%arg0: i32) -> (i32, i32) {
    %c0_i32 = arith.constant 0 : i32
    %c0_i32_0 = arith.constant 0 : i32
    %c0_i32_1 = arith.constant 0 : i32
    return %c0_i32, %c0_i32_0 : i32, i32
  }
  func.func @transform_4(%arg0: i32) -> (i32, i32) {
    %c0_i32 = arith.constant 0 : i32
    %c0_i32_0 = arith.constant 0 : i32
    %c0_i32_1 = arith.constant 0 : i32
    return %c0_i32, %c0_i32_0 : i32, i32
  }
  func.func @transform_5(%arg0: i32) -> (i32, i32) {
    %c0_i32 = arith.constant 0 : i32
    %c0_i32_0 = arith.constant 0 : i32
    return %arg0, %c0_i32 : i32, i32
  }
}

</mosaic_0001>

<bundles_post_ra>
// kernel: actor_forward.1
= control target key start
LH: loop header
LB: loop body
LE: loop exit
PB: predicated region body
PF: predicated region fallthrough
CT: control target
= control target key end

     0   :  { %v383_v1 = vmov 0.0   ;;  %vm384_vm0 = vmmov 0   ;;  %s476_s0 = inlined_call_operand.vmem [shape: bf16[8,128], index: 0, kind: input, shape index: {}]   ;;  %s477_s1 = inlined_call_operand.vmem [shape: bf16[128,128], index: 1, kind: input, shape index: {}]   ;;  %s478_s2 = inlined_call_operand.vmem [shape: f32[1,128], index: 2, kind: input, shape index: {}]   ;;  %s479_s3 = inlined_call_operand.vmem [shape: bf16[128,128], index: 3, kind: input, shape index: {}]   ;;  %s480_s4 = inlined_call_operand.vmem [shape: f32[1,128], index: 4, kind: input, shape index: {}]   ;;  %s481_s5 = inlined_call_operand.hbm [shape: f32[8,128], index: 5, kind: output, shape index: {}]  }
   0x1   :  { %v343_v0 = vld [vmem:[%s477_s1 + $0x38] sm:$0xff]   ;;  %300 = vmatprep.subr.bf16.mxu0 %v383_v1  ;;  %320 = vmatprep.subr.bf16.mxu1 %v383_v1  ;;  %v344_v2 = vld [vmem:[%s477_s1 + $0x30] sm:$0xff]   ;;  %v345_v3 = vld [vmem:[%s477_s1 + $0x28] sm:$0xff]  }
   0x2   :  { %301 = vmatpush3.bf16.msra.mxu0 %v343_v0  ;;  %316 = vmatprep.mubr.msk.bf16.mxu0 %vm384_vm0, %v383_v1  ;;  %v351_v4 = vld [vmem:[%s479_s3 + $0x38] sm:$0xff]   ;;  %v346_v5 = vld [vmem:[%s477_s1 + $0x20] sm:$0xff]   ;;  %v352_v6 = vld [vmem:[%s479_s3 + $0x30] sm:$0xff]  }
   0x3   :  { %302 = vmatprep.subr.bf16.mxu0 %v383_v1  ;;  %336 = vmatprep.mubr.msk.bf16.mxu1 %vm384_vm0, %v383_v1  ;;  %v347_v7 = vld [vmem:[%s477_s1 + $0x18] sm:$0xff]   ;;  %v353_v8 = vld [vmem:[%s479_s3 + $0x28] sm:$0xff]  }
   0x4   :  { %321 = vmatpush3.bf16.msra.mxu1 %v351_v4 }
   0x5   :  { %322 = vmatprep.subr.bf16.mxu1 %v383_v1 }
   0x6   :  { %303 = vmatpush3.bf16.msra.mxu0 %v344_v2 }
   0x7   :  { %304 = vmatprep.subr.bf16.mxu0 %v383_v1 }
   0x8   :  { %323 = vmatpush3.bf16.msra.mxu1 %v352_v6 }
   0x9   :  { %324 = vmatprep.subr.bf16.mxu1 %v383_v1 }
   0xa   :  { %305 = vmatpush3.bf16.msra.mxu0 %v345_v3 }
   0xb   :  { %306 = vmatprep.subr.bf16.mxu0 %v383_v1 }
   0xe   :  { %307 = vmatpush3.bf16.msra.mxu0 %v346_v5 }
   0xf   :  { %308 = vmatprep.subr.bf16.mxu0 %v383_v1 }
  0x10   :  { %10 = vsyncpa [#allocation3], 0  ;;  %v348_v9 = vld [vmem:[%s477_s1 + $0x10] sm:$0xff]   ;;  %325 = vmatpush3.bf16.msra.mxu1 %v353_v8  ;;  %v354_v10 = vld [vmem:[%s479_s3 + $0x20] sm:$0xff]  }
  0x11   :  { %326 = vmatprep.subr.bf16.mxu1 %v383_v1  ;;  %v349_v11 = vld [vmem:[%s477_s1 + $0x8] sm:$0xff]   ;;  %v355_v12 = vld [vmem:[%s479_s3 + $0x18] sm:$0xff]   ;;  %v350_v13 = vld [vmem:[%s477_s1] sm:$0xff]  }
  0x12   :  { %309 = vmatpush3.bf16.msra.mxu0 %v347_v7  ;;  %v356_v14 = vld [vmem:[%s479_s3 + $0x10] sm:$0xff]   ;;  %v22_v15 = vld [vmem:[%s476_s0] sm:$0xf]  ;;  %v357_v16 = vld [vmem:[%s479_s3 + $0x8] sm:$0xff]  }
  0x13   :  { %310 = vmatprep.subr.bf16.mxu0 %v383_v1  ;;  %v358_v17 = vld [vmem:[%s479_s3] sm:$0xff]   ;;  %s385_s3 = smov [#allocation2]  }
  0x14   :  { %327 = vmatpush3.bf16.msra.mxu1 %v354_v10  ;;  %v264_v18 = vld [vmem:[%s478_s2] ss:$0 sm:$0xff]  ;;  %s256_s2 = sshll.u32 %s385_s3, 4  ;;  %s257_s2 = int_to_ptr.vmem [resolvable:$true] %s256_s2 }
  0x15   :  { %328 = vmatprep.subr.bf16.mxu1 %v383_v1  ;;  %v273_v26 = vld [vmem:[%s480_s4] ss:$0 sm:$0xff]  ;;  %s361_s29 = scalar_lea.vmem %s257_s2, 128  ;;  %p366_p1 = scmp.lt.s32.totalorder %s257_s2, %s257_s2 }
  0x16   :  { %311 = vmatpush3.bf16.msra.mxu0 %v348_v9  ;;  %p362_p0 = scmp.ne.s32.totalorder %s257_s2, %s361_s29  ;;  %p367_p2 = scmp.lt.s32.totalorder %s361_s29, %s361_s29 }
  0x17   :  { %312 = vmatprep.subr.bf16.mxu0 %v383_v1 }
  0x18   :  { %329 = vmatpush3.bf16.msra.mxu1 %v355_v12  ;;  %p368_p3 = por %p367_p2, %p366_p1 }
  0x19   :  { %330 = vmatprep.subr.bf16.mxu1 %v383_v1 }
  0x1a   :  { %313 = vmatpush3.bf16.msra.mxu0 %v349_v11  ;;  %p369_p4 = pnand %p368_p3, %p362_p0 }
  0x1b   :  { %314 = vmatprep.subr.bf16.mxu0 %v383_v1 }
  0x1c   :  { %331 = vmatpush3.bf16.msra.mxu1 %v356_v14 }
  0x1d   :  { %332 = vmatprep.subr.bf16.mxu1 %v383_v1 }
  0x1e   :  { %315 = vmatpush3.bf16.msra.mxu0 %v350_v13 }
  0x20   :  { %333 = vmatpush3.bf16.msra.mxu1 %v357_v16 }
  0x21   :  { %317 = vmatmul.mubr.bf16.vlgmr.msra.gmra.mxu0 %v22_v15  ;;  %334 = vmatprep.subr.bf16.mxu1 %v383_v1 }
  0x24   :  { %335 = vmatpush3.bf16.msra.mxu1 %v358_v17 }
  0xe1   :  { %v128_v19 = vpop.f32.mrf.mxu0 }
  0xe2   :  { %v129_v20 = vadd.f32 %v264_v18, %v128_v19 }
  0xe3   :  { %v318_v21 = vpop.f32.mrf.mxu0 }
  0xe4   :  { %v134_v22 = vmax.f32 %v129_v20, 0.0 }
  0xe5   :  { %v131_v23 = vpop.f32.mrf.mxu0 }
  0xe6   :  { %v135_v24 = vpack.c.bf16 %v134_v22, %v134_v22 }
  0xe7   :  { %v319_v25 = vpop.f32.mrf.mxu0 }
  0xe8   :  { %337 = vmatmul.mubr.bf16.vlgmr.msra.gmra.mxu1 %v135_v24 }
 0x1a8   :  { %v241_v27 = vpop.f32.mrf.mxu1 }
 0x1a9   :  { %v242_v28 = vadd.f32 %v273_v26, %v241_v27 }
 0x1aa   :  { %v338_v29 = vpop.f32.mrf.mxu1 }
 0x1ab   :  { %359 = vtanh.f32 %v242_v28 }
 0x1ac   :  { %v244_v30 = vpop.f32.mrf.mxu1 }
 0x1ae   :  { %v339_v31 = vpop.f32.mrf.mxu1 }
 0x1b8   :  { %v360_v32 = vpop.eup %359 }
 0x1b9   :  { %v248_v33 = vmul.f32 2.0, %v360_v32 }
 0x1bb   :  { %249 = vst [vmem:[#allocation2] sm:$0xff] %v248_v33 }
 0x1bc   :  { %372 = shalt.err (!%p369_p4)
}
 0x1bd   :  { %259 = dma.vmem_to_hbm [thread:$0]  %s257_s2, 128, %s481_s5, [#allocation3]  }
 0x1be   :  { %381 = dma.done.wait [#allocation3], 128  }
 0x1bf   :  { %382 = vsyncadd [#allocation3], 4294967168 }
 0x1c0   :  { %263 = vsyncpa [#allocation3], 1 }

</bundles_post_ra>
